<compile_context>
chip_gen: v7x
topology: tpu7x:2x2x1
jax: 0.10.0
libtpu: 0.0.40
codegen_flags: <defaults>
</compile_context>

<pallas_src>
import functools

import jax
import jax.numpy as jnp
from jax.experimental import pallas as pl
from jax.experimental.pallas import tpu as pltpu

_LANE = 128
_PROP_VMEM_BUDGET = 36 << 20   # conservative working-set budget (fits v7x 64 MiB)
_FT_VMEM_BUDGET = 16 << 20


def _round_up(x, m):
    return ((x + m - 1) // m) * m


def _vmem_limit(need_bytes):
    # explicit scoped-VMEM limit: working set + slack, never above what any
    # generation can physically provide.
    return int(min(max(need_bytes + (8 << 20), 32 << 20), 64 << 20))


def _plan_propagation(n, fout_p, out_bytes):
    """Return (n_p, tm, tk, xw_resident) for the propagation kernel."""
    n_p = _round_up(n, _LANE)
    xw_bytes = n_p * fout_p * 2                      # bf16, single copy
    # Preferred: single reduction step (tk == n_p) -> no accumulator.
    for tm in (n_p, 1024, 512, 256, 128):
        if n_p % tm:
            continue
        need = (2 * tm * n_p * 2                     # A row slab, bf16, double buffered
                + 2 * xw_bytes                       # resident XW (conservatively x2)
                + 2 * tm * fout_p * out_bytes)       # output double buffer
        if need <= _PROP_VMEM_BUDGET:
            return n_p, tm, n_p, True
    # Huge-graph fallback: 2-D (row, col) grid with an f32 accumulator.
    tm, tk = 512, 2048
    n_p = _round_up(n, tk)                           # tk multiple of tm
    xw_resident = (n_p * fout_p * 2) <= (16 << 20)
    return n_p, tm, tk, xw_resident


def _plan_feature_transform(n_p, fin_p, fout_p, x_bytes):
    """Largest row tile for X @ W that divides n_p and fits the FT budget."""
    for tm in (n_p, 2048, 1024, 512, 256, 128):
        if n_p % tm:
            continue
        need = (2 * tm * fin_p * x_bytes
                + 2 * fin_p * fout_p * 4
                + 2 * tm * fout_p * 2)
        if need <= _FT_VMEM_BUDGET:
            return tm, need
    return 128, _FT_VMEM_BUDGET


# ----------------------------------------------------------------------------
# Kernel 1: feature transform  XW = X @ W   (computed once per layer)
# ----------------------------------------------------------------------------
def feature_transform_kernel(x_ref, w_ref, o_ref):
    o_ref[...] = jnp.dot(
        x_ref[...], w_ref[...], preferred_element_type=jnp.float32
    ).astype(o_ref.dtype)


def feature_transform(x_p, w_p):
    n_p, fin_p = x_p.shape
    fout_p = w_p.shape[1]
    tm, need = _plan_feature_transform(n_p, fin_p, fout_p, x_p.dtype.itemsize)
    return pl.pallas_call(
        feature_transform_kernel,
        out_shape=jax.ShapeDtypeStruct((n_p, fout_p), jnp.bfloat16),
        grid_spec=pltpu.PrefetchScalarGridSpec(
            num_scalar_prefetch=0,
            grid=(n_p // tm,),
            in_specs=[
                pl.BlockSpec((tm, fin_p), lambda i: (i, 0)),      # X row block
                pl.BlockSpec((fin_p, fout_p), lambda i: (0, 0)),  # full W (resident)
            ],
            out_specs=pl.BlockSpec((tm, fout_p), lambda i: (i, 0)),
        ),
        compiler_params=pltpu.CompilerParams(
            dimension_semantics=("parallel",),
            vmem_limit_bytes=_vmem_limit(need),
        ),
    )(x_p, w_p)


# ----------------------------------------------------------------------------
# Kernel 2a: propagation, single reduction step (tk == n_p)
#   out = A_rowslab @ XW + b  [+ ReLU]   -- no accumulator needed.
# ----------------------------------------------------------------------------
def propagate_single_kernel(a_ref, xw_ref, b_ref, o_ref, *, apply_relu):
    out = jnp.dot(a_ref[...], xw_ref[...], preferred_element_type=jnp.float32)
    out = out + b_ref[...]
    if apply_relu:
        out = jnp.maximum(out, 0.0)
    o_ref[...] = out.astype(o_ref.dtype)


# ----------------------------------------------------------------------------
# Kernel 2b: propagation, 2-D (row, col) grid for huge graphs.
#   f32 VMEM accumulator, initialized with the bias at k==0; ReLU/cast at last.
# ----------------------------------------------------------------------------
def propagate_multi_kernel(a_ref, xw_ref, b_ref, o_ref, acc_ref, *,
                           apply_relu, xw_resident, tk):
    k = pl.program_id(1)

    @pl.when(k == 0)
    def _():
        acc_ref[...] = jnp.zeros(acc_ref.shape, jnp.float32) + b_ref[...]

    if xw_resident:
        start = pl.multiple_of(k * tk, tk)
        xw_blk = xw_ref[pl.ds(start, tk), :]
    else:
        xw_blk = xw_ref[...]
    acc_ref[...] += jnp.dot(a_ref[...], xw_blk, preferred_element_type=jnp.float32)

    @pl.when(k == pl.num_programs(1) - 1)
    def _():
        out = acc_ref[...]
        if apply_relu:
            out = jnp.maximum(out, 0.0)
        o_ref[...] = out.astype(o_ref.dtype)


def propagate(a_p, xw_p, b_p, *, apply_relu, out_dtype, tm, tk, xw_resident):
    n_p = a_p.shape[0]
    fout_p = xw_p.shape[1]
    out_bytes = jnp.dtype(out_dtype).itemsize

    if tk == n_p:
        # single reduction step: whole row slab of A vs fully resident XW.
        need = (2 * tm * n_p * 2 + 2 * n_p * fout_p * 2
                + 2 * tm * fout_p * out_bytes)
        return pl.pallas_call(
            functools.partial(propagate_single_kernel, apply_relu=apply_relu),
            out_shape=jax.ShapeDtypeStruct((n_p, fout_p), out_dtype),
            grid_spec=pltpu.PrefetchScalarGridSpec(
                num_scalar_prefetch=0,
                grid=(n_p // tm,),
                in_specs=[
                    pl.BlockSpec((tm, n_p), lambda i: (i, 0)),        # A row slab (bf16)
                    pl.BlockSpec((n_p, fout_p), lambda i: (0, 0)),    # XW resident (bf16)
                    pl.BlockSpec((1, fout_p), lambda i: (0, 0)),      # bias (f32)
                ],
                out_specs=pl.BlockSpec((tm, fout_p), lambda i: (i, 0)),
            ),
            compiler_params=pltpu.CompilerParams(
                dimension_semantics=("parallel",),
                vmem_limit_bytes=_vmem_limit(need),
            ),
        )(a_p, xw_p, b_p)

    # huge-graph fallback: 2-D grid, f32 accumulator.
    if xw_resident:
        xw_spec = pl.BlockSpec((n_p, fout_p), lambda i, k: (0, 0))
        xw_need = 2 * n_p * fout_p * 2
    else:
        xw_spec = pl.BlockSpec((tk, fout_p), lambda i, k: (k, 0))
        xw_need = 2 * tk * fout_p * 2
    need = (2 * tm * tk * 2 + xw_need
            + 2 * tm * fout_p * out_bytes + tm * fout_p * 4)
    return pl.pallas_call(
        functools.partial(propagate_multi_kernel, apply_relu=apply_relu,
                          xw_resident=xw_resident, tk=tk),
        out_shape=jax.ShapeDtypeStruct((n_p, fout_p), out_dtype),
        grid_spec=pltpu.PrefetchScalarGridSpec(
            num_scalar_prefetch=0,
            grid=(n_p // tm, n_p // tk),
            in_specs=[
                pl.BlockSpec((tm, tk), lambda i, k: (i, k)),          # A block (bf16)
                xw_spec,                                              # XW (bf16)
                pl.BlockSpec((1, fout_p), lambda i, k: (0, 0)),       # bias (f32)
            ],
            out_specs=pl.BlockSpec((tm, fout_p), lambda i, k: (i, 0)),
            scratch_shapes=[pltpu.VMEM((tm, fout_p), jnp.float32)],
        ),
        compiler_params=pltpu.CompilerParams(
            dimension_semantics=("parallel", "arbitrary"),
            vmem_limit_bytes=_vmem_limit(need),
        ),
    )(a_p, xw_p, b_p)


# ----------------------------------------------------------------------------
# One PPMIConv layer on padded operands.
# ----------------------------------------------------------------------------
def ppmi_conv_layer(a_p_bf16, x_p, w, b, *, apply_relu, tm, tk, xw_resident):
    fin, fout = w.shape
    fin_p = x_p.shape[1]
    fout_p = _round_up(fout, _LANE)
    # zero-pad W/b to lane-dense shapes; padded output columns stay exactly 0.
    w_p = jnp.zeros((fin_p, fout_p), jnp.float32).at[:fin, :fout].set(w)
    b_p = jnp.zeros((1, fout_p), jnp.float32).at[0, :fout].set(b)

    xw_p = feature_transform(x_p, w_p)                       # bf16 [N_p, Fout_p]
    # intermediate-layer activations stay bf16 (halves HBM traffic); final f32.
    out_dtype = jnp.bfloat16 if apply_relu else jnp.float32
    return propagate(a_p_bf16, xw_p, b_p, apply_relu=apply_relu,
                     out_dtype=out_dtype, tm=tm, tk=tk, xw_resident=xw_resident)


# ----------------------------------------------------------------------------
# Glue: build the PPMI propagation matrix from edge_index (deterministic,
# transition-matrix-power formulation of the path_len random walk).
# ----------------------------------------------------------------------------
def compute_ppmi_norm_adj(edge_index, num_nodes, path_len):
    n = num_nodes
    a = jnp.zeros((n, n), jnp.float32)
    a = a.at[edge_index[0], edge_index[1]].set(1.0)
    a = jnp.maximum(a, a.T)                # symmetrize (undirected graph)
    a = a + jnp.eye(n, dtype=jnp.float32)  # self loops

    deg = a.sum(axis=1, keepdims=True)
    p = a / deg                            # row-stochastic transition matrix

    # average visit frequencies over walks of length 1..path_len
    freq = jnp.zeros((n, n), jnp.float32)
    pk = jnp.eye(n, dtype=jnp.float32)
    for _ in range(path_len):
        pk = pk @ p
        freq = freq + pk
    freq = freq / float(path_len)

    # positive pointwise mutual information
    total = freq.sum()
    pij = freq / total
    pi = pij.sum(axis=1, keepdims=True)
    pj = pij.sum(axis=0, keepdims=True)
    ppmi = jnp.maximum(jnp.log(pij / (pi * pj) + 1e-12), 0.0)

    # GCN-style symmetric normalization of the PPMI weights
    d = ppmi.sum(axis=1)
    d_inv_sqrt = jnp.where(d > 0, 1.0 / jnp.sqrt(d), 0.0)
    return d_inv_sqrt[:, None] * ppmi * d_inv_sqrt[None, :]


# ----------------------------------------------------------------------------
# IGCN forward: stack of PPMIConv layers, ReLU (+ dropout, identity in eval).
# ----------------------------------------------------------------------------
def igcn_forward(x, edge_index, params, k):
    # cache_name argument of the PyTorch module is only a caching key -> ignored.
    n, fin = x.shape
    a_norm = compute_ppmi_norm_adj(edge_index, n, k)

    # One propagation plan shared by all layers (A is padded once).
    fout_p_max = max(_round_up(w.shape[1], _LANE) for w, _ in params)
    n_p, tm, tk, xw_resident = _plan_propagation(n, fout_p_max, out_bytes=4)
    fin_p = _round_up(fin, _LANE)

    # Pad once (zero rows/cols of A neutralize padded node rows of activations),
    # cast the memory-bound N x N operand to bf16.
    # TODO(synk): optional int8 (v5e/v6e) / fp8-e4m3 (v7x) quantization of A for
    # another ~2x on the dominant HBM stream, pending accuracy validation.
    a_p = (
        jnp.zeros((n_p, n_p), jnp.float32).at[:n, :n].set(a_norm)
    ).astype(jnp.bfloat16)
    x_p = jnp.zeros((n_p, fin_p), jnp.float32).at[:n, :fin].set(x)

    num_layers = len(params)
    for i, (w, b) in enumerate(params):
        apply_relu = i < num_layers - 1
        x_p = ppmi_conv_layer(a_p, x_p, w, b, apply_relu=apply_relu,
                              tm=tm, tk=tk, xw_resident=xw_resident)
        # nn.Dropout in eval mode is identity; not applied here.
        # TODO(synk): training-mode dropout (pltpu.prng_random_bits) not wired in.

    fout_last = params[-1][0].shape[1]
    return x_p[:n, :fout_last]


def igcn_reference(x, edge_index, params, k):
    """Pure-JAX f32 reference for correctness checking."""
    n = x.shape[0]
    a_norm = compute_ppmi_norm_adj(edge_index, n, k)
    num_layers = len(params)
    for i, (w, b) in enumerate(params):
        x = a_norm @ (x @ w) + b
        if i < num_layers - 1:
            x = jnp.maximum(x, 0.0)
    return x


def init_params(key, hidden_dims):
    params = []
    for i in range(len(hidden_dims) - 1):
        key, kw = jax.random.split(key)
        fin, fout = hidden_dims[i], hidden_dims[i + 1]
        # Glorot-uniform weight, zero bias (GCNConv-style init), deterministic.
        limit = (6.0 / (fin + fout)) ** 0.5
        w = jax.random.uniform(kw, (fin, fout), jnp.float32, -limit, limit)
        b = jnp.zeros((fout,), jnp.float32)
        params.append((w, b))
    return params


if __name__ == "__main__":
    key = jax.random.PRNGKey(0)

    num_nodes = 64
    num_edges = 256
    num_gcn_layers = 2
    hidden_dims = [16, 32, 8]
    k = 3  # PPMI random-walk path length

    k_x, k_e, k_p = jax.random.split(key, 3)
    x = jax.random.normal(k_x, (num_nodes, hidden_dims[0]), jnp.float32)
    edge_index = jax.random.randint(k_e, (2, num_edges), 0, num_nodes, jnp.int32)
    params = init_params(k_p, hidden_dims)

    out = igcn_forward(x, edge_index, params, k)
    jax.block_until_ready(out)

    ref = igcn_reference(x, edge_index, params, k)
    assert out.shape == (num_nodes, hidden_dims[-1])
    assert bool(jnp.all(jnp.isfinite(out)))
    # bf16 A/XW/intermediate activations with f32 accumulation -> loose tolerance.
    assert bool(jnp.allclose(out, ref, atol=1e-1, rtol=1e-1)), float(
        jnp.max(jnp.abs(out - ref))
    )
    print("KERNEL_OK")
</pallas_src>

<mosaic_0001>
module attributes {stable_mosaic.version = 11 : i64} {
  func.func @feature_transform_kernel(%arg0: i32, %arg1: memref<128x128xf32, #tpu.memory_space<vmem>>, %arg2: memref<128x128xf32, #tpu.memory_space<vmem>>, %arg3: memref<128x128xbf16, #tpu.memory_space<vmem>>) attributes {dimension_semantics = [#tpu.dimension_semantics<parallel>], iteration_bounds = array<i64: 1>, scalar_prefetch = 0 : i64, scratch_operands = 0 : i64, tpu.core_type = #tpu.core_type<tc>, window_params = [{transform_indices = @transform_0, window_bounds = array<i64: 128, 128>}, {pipeline_mode = #tpu.pipeline_mode<synchronous>, transform_indices = @transform_1, window_bounds = array<i64: 128, 128>}, {transform_indices = @transform_2, window_bounds = array<i64: 128, 128>}]} {
    %c0 = arith.constant 0 : index
    %c0_0 = arith.constant 0 : index
    %0 = vector.load %arg1[%c0, %c0_0] : memref<128x128xf32, #tpu.memory_space<vmem>>, vector<128x128xf32>
    %c0_1 = arith.constant 0 : index
    %c0_2 = arith.constant 0 : index
    %1 = vector.load %arg2[%c0_1, %c0_2] : memref<128x128xf32, #tpu.memory_space<vmem>>, vector<128x128xf32>
    %cst = arith.constant dense<0.000000e+00> : vector<128x128xf32>
    %2 = tpu.matmul %0, %1, %cst {dimension_numbers = #tpu.dot_dimension_numbers<[1], [0], [0], [1], [0, 0, 1, 1], [], []>} : vector<128x128xf32>, vector<128x128xf32>, vector<128x128xf32> -> vector<128x128xf32>
    %3 = arith.truncf %2 : vector<128x128xf32> to vector<128x128xbf16>
    %c0_3 = arith.constant 0 : index
    %c0_4 = arith.constant 0 : index
    %4 = vector.load %arg3[%c0_3, %c0_4] : memref<128x128xbf16, #tpu.memory_space<vmem>>, vector<128x128xbf16>
    tpu.vector_store %arg3[%c0_3, %c0_4], %3 {strides = array<i32>} : memref<128x128xbf16, #tpu.memory_space<vmem>>, vector<128x128xbf16>,
    return
  }
  func.func @transform_0(%arg0: i32) -> (i32, i32) {
    %c0_i32 = arith.constant 0 : i32
    %c0_i32_0 = arith.constant 0 : i32
    return %arg0, %c0_i32 : i32, i32
  }
  func.func @transform_1(%arg0: i32) -> (i32, i32) {
    %c0_i32 = arith.constant 0 : i32
    %c0_i32_0 = arith.constant 0 : i32
    %c0_i32_1 = arith.constant 0 : i32
    return %c0_i32, %c0_i32_0 : i32, i32
  }
  func.func @transform_2(%arg0: i32) -> (i32, i32) {
    %c0_i32 = arith.constant 0 : i32
    %c0_i32_0 = arith.constant 0 : i32
    return %arg0, %c0_i32 : i32, i32
  }
}

</mosaic_0001>

<bundles_post_ra>
// kernel: tpu_custom_call.1
= control target key start
LH: loop header
LB: loop body
LE: loop exit
PB: predicated region body
PF: predicated region fallthrough
CT: control target
= control target key end

     0   :  { %7 = vsyncpa [#allocation3], 0  ;;  %s667_s0 = inlined_call_operand.hbm [shape: f32[128,128], index: 0, kind: input, shape index: {}]   ;;  %s668_s1 = inlined_call_operand.hbm [shape: f32[128,128], index: 1, kind: input, shape index: {}]   ;;  %s669_s2 = inlined_call_operand.hbm [shape: bf16[128,128], index: 2, kind: output, shape index: {}]  }
   0x1   :  { %8 = vsyncpa [#allocation6], 0 }
   0x2   :  { %9 = vsyncpa [#allocation4], 0  ;;  %s609_s9 = smov [#allocation2]   ;;  %s537_s13 = scalar_lea.hbm %s667_s0, 2048 }
   0x3   :  { %s15_s10 = sshll.u32 %s609_s9, 4  ;;  %p538_p0 = scmp.ne.s32.totalorder %s667_s0, %s537_s13  ;;  %s16_s10 = int_to_ptr.vmem [resolvable:$true] %s15_s10 }
   0x4   :  { %p541_p1 = scmp.lt.u32.totalorder %s537_s13, %s667_s0 }
   0x6   :  { %p543_p2 = pnand %p541_p1, %p538_p0 }
   0x8   :  { %546 = shalt.err (!%p543_p2)
}
   0x9   :  { %s547_s18 = scalar_lea.vmem %s16_s10, 2048  ;;  %p552_p4 = scmp.lt.s32.totalorder %s16_s10, %s16_s10 }
   0xa   :  { %p548_p3 = scmp.ne.s32.totalorder %s16_s10, %s547_s18  ;;  %p553_p5 = scmp.lt.s32.totalorder %s547_s18, %s547_s18 }
   0xc   :  { %p554_p6 = por %p553_p5, %p552_p4 }
   0xe   :  { %p555_p7 = pnand %p554_p6, %p548_p3 }
  0x10   :  { %558 = shalt.err (!%p555_p7)
}
  0x11   :  { %s610_s19 = smov 128   ;;  %s611_s20 = smov 8  }
  0x12   :  { %21 = dma.hbm_to_vmem [thread:$0]  %s667_s0, 2048, %s16_s10, [#allocation3], %s610_s19, %s610_s19, %s611_s20  }
  0x13   :  { %s612_s23 = smov [#allocation5]   ;;  %s559_s27 = scalar_lea.hbm %s668_s1, 2048 }
  0x14   :  { %s27_s24 = sshll.u32 %s612_s23, 4  ;;  %p560_p8 = scmp.ne.s32.totalorder %s668_s1, %s559_s27  ;;  %s28_s24 = int_to_ptr.vmem [resolvable:$true] %s27_s24 }
  0x15   :  { %p563_p9 = scmp.lt.u32.totalorder %s559_s27, %s668_s1 }
  0x17   :  { %p565_p10 = pnand %p563_p9, %p560_p8 }
  0x19   :  { %568 = shalt.err (!%p565_p10)
}
  0x1a   :  { %s569_s4 = scalar_lea.vmem %s28_s24, 2048  ;;  %p574_p12 = scmp.lt.s32.totalorder %s28_s24, %s28_s24 }
  0x1b   :  { %p570_p11 = scmp.ne.s32.totalorder %s28_s24, %s569_s4  ;;  %p575_p13 = scmp.lt.s32.totalorder %s569_s4, %s569_s4 }
  0x1d   :  { %p576_p0 = por %p575_p13, %p574_p12 }
  0x1f   :  { %p577_p1 = pnand %p576_p0, %p570_p11 }
  0x21   :  { %580 = shalt.err (!%p577_p1)
}
  0x22   :  { %33 = dma.hbm_to_vmem [thread:$0]  %s668_s1, 2048, %s28_s24, [#allocation6], %s610_s19, %s610_s19, %s611_s20  }
  0x23   :  { %603 = dma.done.wait [#allocation3], 2048  }
  0x24   :  { %604 = vsyncadd [#allocation3], 4294965248 }
  0x25   :  { %605 = dma.done.wait [#allocation6], 2048  }
  0x26   :  { %606 = vsyncadd [#allocation6], 4294965248  ;;  %v56_v0 = vld [vmem:[#allocation5] sm:$0xff]  ;;  %v57_v1 = vld [vmem:[#allocation5 + $0x8] sm:$0xff]  ;;  %s613_s1 = smov [#allocation7]  }
  0x27   :  { %v58_v2 = vld [vmem:[#allocation5 + $0x10] sm:$0xff]  ;;  %v482_v3 = vpack.c.bf16 %v57_v1, %v56_v0  ;;  %v59_v4 = vld [vmem:[#allocation5 + $0x18] sm:$0xff]  ;;  %v60_v6 = vld [vmem:[#allocation5 + $0x20] sm:$0xff]  ;;  %s302_s6 = sshll.u32 %s613_s1, 4  ;;  %s303_s6 = int_to_ptr.vmem [resolvable:$true] %s302_s6 }
  0x28   :  { %v486_v5 = vpack.c.bf16 %v59_v4, %v58_v2  ;;  %v61_v7 = vld [vmem:[#allocation5 + $0x28] sm:$0xff]  ;;  %v40_v9 = vld [vmem:[#allocation2] sm:$0xff]  ;;  %v62_v11 = vld [vmem:[#allocation5 + $0x30] sm:$0xff]  ;;  %s581_s7 = scalar_lea.vmem %s303_s6, 1024  ;;  %p586_p3 = scmp.lt.s32.totalorder %s303_s6, %s303_s6 }
  0x29   :  { %483 = vmatprep.subr.bf16.mxu0 %v482_v3  ;;  %514 = vmatprep.subr.bf16.mxu1 %v482_v3  ;;  %v490_v8 = vpack.c.bf16 %v61_v7, %v60_v6  ;;  %v48_v10 = vld [vmem:[#allocation2 + $0x40] sm:$0xff]  ;;  %v63_v12 = vld [vmem:[#allocation5 + $0x38] sm:$0xff]  ;;  %v65_v15 = vld [vmem:[#allocation5 + $0x48] sm:$0xff]  ;;  %p582_p2 = scmp.ne.s32.totalorder %s303_s6, %s581_s7  ;;  %p587_p4 = scmp.lt.s32.totalorder %s581_s7, %s581_s7 }
  0x2a   :  { %485 = vmatpush3.bf16.msra.mxu0 %v482_v3  ;;  %522 = vmatpush3.bf16.msra.mxu1 %v482_v3  ;;  %v494_v13 = vpack.c.bf16 %v63_v12, %v62_v11  ;;  %v64_v14 = vld [vmem:[#allocation5 + $0x40] sm:$0xff]  ;;  %v66_v17 = vld [vmem:[#allocation5 + $0x50] sm:$0xff]  ;;  %v67_v18 = vld [vmem:[#allocation5 + $0x58] sm:$0xff] }
  0x2b   :  { %487 = vmatprep.subr.bf16.mxu0 %v486_v5  ;;  %515 = vmatprep.subr.bf16.mxu1 %v486_v5  ;;  %v498_v16 = vpack.c.bf16 %v65_v15, %v64_v14  ;;  %v502_v19 = vpack.c.bf16 %v67_v18, %v66_v17  ;;  %v68_v20 = vld [vmem:[#allocation5 + $0x60] sm:$0xff]  ;;  %v69_v21 = vld [vmem:[#allocation5 + $0x68] sm:$0xff]  ;;  %v70_v23 = vld [vmem:[#allocation5 + $0x70] sm:$0xff]  ;;  %p588_p5 = por %p587_p4, %p586_p3 }
  0x2c   :  { %458 = vmatprep.mubr.f32.mxu0 %v40_v9  ;;  %470 = vmatprep.mubr.f32.mxu1 %v48_v10  ;;  %v506_v22 = vpack.c.bf16 %v69_v21, %v68_v20  ;;  %v71_v24 = vld [vmem:[#allocation5 + $0x78] sm:$0xff]  ;;  %v41_v26 = vld [vmem:[#allocation2 + $0x8] sm:$0xff]  ;;  %v42_v28 = vld [vmem:[#allocation2 + $0x10] sm:$0xff] }
  0x2d   :  { %v510_v25 = vpack.c.bf16 %v71_v24, %v70_v23  ;;  %v49_v27 = vld [vmem:[#allocation2 + $0x48] sm:$0xff]  ;;  %v50_v29 = vld [vmem:[#allocation2 + $0x50] sm:$0xff]  ;;  %v43_v30 = vld [vmem:[#allocation2 + $0x18] sm:$0xff]  ;;  %p589_p6 = pnand %p588_p5, %p582_p2 }
  0x2e   :  { %489 = vmatpush3.bf16.msra.mxu0 %v486_v5  ;;  %523 = vmatpush3.bf16.msra.mxu1 %v486_v5  ;;  %v51_v31 = vld [vmem:[#allocation2 + $0x58] sm:$0xff]  ;;  %v44_v32 = vld [vmem:[#allocation2 + $0x20] sm:$0xff]  ;;  %v45_v34 = vld [vmem:[#allocation2 + $0x28] sm:$0xff] }
  0x2f   :  { %491 = vmatprep.subr.bf16.mxu0 %v490_v8  ;;  %516 = vmatprep.subr.bf16.mxu1 %v490_v8  ;;  %v52_v33 = vld [vmem:[#allocation2 + $0x60] sm:$0xff]  ;;  %v53_v35 = vld [vmem:[#allocation2 + $0x68] sm:$0xff]  ;;  %v46_v36 = vld [vmem:[#allocation2 + $0x30] sm:$0xff] }
  0x30   :  { %v54_v37 = vld [vmem:[#allocation2 + $0x70] sm:$0xff]  ;;  %v47_v38 = vld [vmem:[#allocation2 + $0x38] sm:$0xff] }
  0x31   :  { %v55_v39 = vld [vmem:[#allocation2 + $0x78] sm:$0xff] }
  0x32   :  { %493 = vmatpush3.bf16.msra.mxu0 %v490_v8  ;;  %524 = vmatpush3.bf16.msra.mxu1 %v490_v8 }
  0x33   :  { %495 = vmatprep.subr.bf16.mxu0 %v494_v13  ;;  %517 = vmatprep.subr.bf16.mxu1 %v494_v13 }
  0x36   :  { %497 = vmatpush3.bf16.msra.mxu0 %v494_v13  ;;  %525 = vmatpush3.bf16.msra.mxu1 %v494_v13 }
  0x37   :  { %499 = vmatprep.subr.bf16.mxu0 %v498_v16  ;;  %518 = vmatprep.subr.bf16.mxu1 %v498_v16 }
  0x3a   :  { %501 = vmatpush3.bf16.msra.mxu0 %v498_v16  ;;  %526 = vmatpush3.bf16.msra.mxu1 %v498_v16 }
  0x3b   :  { %503 = vmatprep.subr.bf16.mxu0 %v502_v19  ;;  %519 = vmatprep.subr.bf16.mxu1 %v502_v19 }
  0x3e   :  { %505 = vmatpush3.bf16.msra.mxu0 %v502_v19  ;;  %527 = vmatpush3.bf16.msra.mxu1 %v502_v19 }
  0x3f   :  { %507 = vmatprep.subr.bf16.mxu0 %v506_v22  ;;  %520 = vmatprep.subr.bf16.mxu1 %v506_v22 }
  0x42   :  { %509 = vmatpush3.bf16.msra.mxu0 %v506_v22  ;;  %528 = vmatpush3.bf16.msra.mxu1 %v506_v22 }
  0x43   :  { %511 = vmatprep.subr.bf16.mxu0 %v510_v25  ;;  %521 = vmatprep.subr.bf16.mxu1 %v510_v25 }
  0x46   :  { %513 = vmatpush3.bf16.msra.mxu0 %v510_v25  ;;  %529 = vmatpush3.bf16.msra.mxu1 %v510_v25 }
  0x49   :  { %459 = vmatmul.mubr.f32.vlgmr.msra.gmra.mrb[0].mxu0 %v41_v26  ;;  %471 = vmatmul.mubr.f32.vlgmr.msra.gmra.mrb[0].mxu1 %v49_v27 }
  0x4a   :  { %461 = vmatprep.mubr.f32.mxu0 %v42_v28  ;;  %473 = vmatprep.mubr.f32.mxu1 %v50_v29 }
  0x4d   :  { %462 = vmatmul.mubr.f32.gmra.mrb[2].mxu0 %v43_v30  ;;  %474 = vmatmul.mubr.f32.gmra.mrb[2].mxu1 %v51_v31 }
  0x4e   :  { %464 = vmatprep.mubr.f32.mxu0 %v44_v32  ;;  %476 = vmatprep.mubr.f32.mxu1 %v52_v33 }
  0x51   :  { %465 = vmatmul.mubr.f32.gmra.mrb[4].mxu0 %v45_v34  ;;  %477 = vmatmul.mubr.f32.gmra.mrb[4].mxu1 %v53_v35 }
  0x52   :  { %467 = vmatprep.mubr.f32.mxu0 %v46_v36  ;;  %479 = vmatprep.mubr.f32.mxu1 %v54_v37 }
  0x55   :  { %468 = vmatmul.mubr.f32.gmra.mrb[6].mxu0 %v47_v38  ;;  %480 = vmatmul.mubr.f32.gmra.mrb[6].mxu1 %v55_v39 }
 0x11c   :  { %v460_v40 = vpop.f32.mrb[0].mxu0  ;;  %v472_v41 = vpop.f32.mrb[0].mxu1 }
 0x11d   :  { %v138_v42 = vpop.f32.mrb[1].mxu0  ;;  %v178_v43 = vpop.f32.mrb[1].mxu1 }
 0x11e   :  { %v350_v44 = vpack.c.bf16 %v460_v40, %v138_v42  ;;  %v370_v45 = vpack.c.bf16 %v472_v41, %v178_v43 }
 0x120   :  { %351 = vst [vmem:[#allocation7] sm:$0xff] %v350_v44   ;;  %390 = vst [vmem:[#allocation7 + $0x20] sm:$0xff] %v370_v45   ;;  %v463_v46 = vpop.f32.mrb[2].mxu0  ;;  %v475_v47 = vpop.f32.mrb[2].mxu1 }
 0x121   :  { %v148_v48 = vpop.f32.mrb[3].mxu0  ;;  %v188_v49 = vpop.f32.mrb[3].mxu1 }
 0x122   :  { %v355_v50 = vpack.c.bf16 %v463_v46, %v148_v48  ;;  %v375_v51 = vpack.c.bf16 %v475_v47, %v188_v49 }
 0x124   :  { %387 = vst [vmem:[#allocation7 + $0x8] sm:$0xff] %v355_v50   ;;  %391 = vst [vmem:[#allocation7 + $0x28] sm:$0xff] %v375_v51   ;;  %v466_v52 = vpop.f32.mrb[4].mxu0  ;;  %v478_v53 = vpop.f32.mrb[4].mxu1 }
 0x125   :  { %v158_v54 = vpop.f32.mrb[5].mxu0  ;;  %v198_v55 = vpop.f32.mrb[5].mxu1 }
 0x126   :  { %v360_v56 = vpack.c.bf16 %v466_v52, %v158_v54  ;;  %v380_v57 = vpack.c.bf16 %v478_v53, %v198_v55 }
 0x128   :  { %388 = vst [vmem:[#allocation7 + $0x10] sm:$0xff] %v360_v56   ;;  %392 = vst [vmem:[#allocation7 + $0x30] sm:$0xff] %v380_v57   ;;  %v469_v58 = vpop.f32.mrb[6].mxu0  ;;  %v481_v59 = vpop.f32.mrb[6].mxu1 }
 0x129   :  { %v168_v60 = vpop.f32.mrb[7].mxu0  ;;  %v208_v61 = vpop.f32.mrb[7].mxu1 }
 0x12a   :  { %v365_v62 = vpack.c.bf16 %v469_v58, %v168_v60  ;;  %v385_v63 = vpack.c.bf16 %v481_v59, %v208_v61 }
 0x12c   :  { %389 = vst [vmem:[#allocation7 + $0x18] sm:$0xff] %v365_v62   ;;  %393 = vst [vmem:[#allocation7 + $0x38] sm:$0xff] %v385_v63  }
 0x12d   :  { %592 = shalt.err (!%p589_p6)
}
 0x12e   :  { %s593_s10 = scalar_lea.hbm %s669_s2, 1024 }
 0x12f   :  { %p594_p7 = scmp.ne.s32.totalorder %s669_s2, %s593_s10  ;;  %p597_p8 = scmp.lt.u32.totalorder %s593_s10, %s669_s2 }
 0x131   :  { %p599_p9 = pnand %p597_p8, %p594_p7 }
 0x133   :  { %602 = shalt.err (!%p599_p9)
}
 0x134   :  { %s614_s15 = smov 64   ;;  %s615_s16 = smov 4  }
 0x135   :  { %308 = dma.vmem_to_hbm [thread:$0]  %s303_s6, 1024, %s669_s2, [#allocation4], %s614_s15, %s614_s15, %s615_s16  }
 0x136   :  { %607 = dma.done.wait [#allocation4], 1024  }
 0x137   :  { %608 = vsyncadd [#allocation4], 4294966272 }
 0x138   :  { %312 = vsyncpa [#allocation3], 1 }
 0x139   :  { %313 = vsyncpa [#allocation6], 1 }
 0x13a   :  { %314 = vsyncpa [#allocation4], 1 }

</bundles_post_ra>
